<compile_context>
chip_gen: v7x
topology: tpu7x:2x2x1
jax: 0.10.0
libtpu: 0.0.40
codegen_flags: <defaults>
</compile_context>

<pallas_src>
import functools

import jax
import jax.numpy as jnp
from jax.experimental import pallas as pl
from jax.experimental.pallas import tpu as pltpu

TIME_STEP = 10
HIDDEN = 32
INPUT_SIZE = 1
LANES = 128


def rnn_kernel(x_ref, h0_ref, p_ref, bout_ref, outs_ref, hT_ref):
    """Fused tanh-RNN recurrence + Linear head, single program.

    x_ref    : (B, T, 1)   f32  input sequence (batch_first, feature dim 1)
    h0_ref   : (1, B, H)   f32  initial hidden state (nn.RNN layout)
    p_ref    : (H+8, 128)  f32  packed parameter slab:
                                rows 0:H         cols 0:H -> W_hh^T
                                rows 0:H         col  H   -> w_out (output head)
                                row  H           cols 0:H -> w_ih  (input_size==1)
                                row  H+1         cols 0:H -> b_ih + b_hh
    bout_ref : (1,)        f32  output Linear bias                 [SMEM]
    outs_ref : (B, T)      f32  per-step outputs (lane-dense)
    hT_ref   : (1, B, H)   f32  final hidden state (aliased onto h0)
    """
    H = HIDDEN
    T = x_ref.shape[1]

    P = p_ref[...]                            # (H+8, 128): one 20 KiB load
    w_cat = P[:H, :]                          # (H, 128) = [W_hh^T | w_out | 0...]
    wih_row = P[H:H + 1, :H][None]            # (1, 1, H)
    b_row = P[H + 1:H + 2, :H][None]          # (1, 1, H)

    # Input contribution + fused RNN bias for every timestep: one VPU pass,
    # entirely off the serial recurrence chain.
    pre = x_ref[...] * wih_row + b_row        # (B, T, H)

    # Recurrence.  carry = h @ W_cat gives both the next step's recurrent term
    # (lanes 0:H) and the current step's output pre-bias (lane H) in one MXU dot.
    h = h0_ref[0]                                                    # (B, H)
    carry = jnp.dot(h, w_cat, preferred_element_type=jnp.float32)    # (B, 128)
    out_cols = []
    for t in range(T):                        # T is static -> fully unrolled
        h = jnp.tanh(pre[:, t, :] + carry[:, :H])                    # h_t
        carry = jnp.dot(h, w_cat, preferred_element_type=jnp.float32)
        out_cols.append(carry[:, H:H + 1])                           # out_t pre-bias

    hT_ref[0] = h

    # Lane-dense output, single store; scalar bias broadcast from SMEM.
    outs_ref[...] = jnp.concatenate(out_cols, axis=1) + bout_ref[0]  # (B, T)


def prepare_params(params):
    """One-time conversion of torch-layout params into the packed kernel slab.

    Done once (outside the forward call) so no transposes/reshapes run per call,
    and so the whole parameter set rides a single DMA.
    """
    w_ih, w_hh, b_ih, b_hh, w_out, b_out = params
    H = HIDDEN
    slab = jnp.zeros((H + 8, LANES), jnp.float32)
    slab = slab.at[:H, :H].set(w_hh.astype(jnp.float32).T)          # W_hh^T
    slab = slab.at[:H, H].set(w_out.astype(jnp.float32).reshape(H))  # output head col
    slab = slab.at[H, :H].set(w_ih.astype(jnp.float32).reshape(H))   # w_ih row
    slab = slab.at[H + 1, :H].set((b_ih + b_hh).astype(jnp.float32))  # fused RNN bias
    bout = b_out.astype(jnp.float32).reshape(1)                       # (1,) SMEM scalar
    return (slab, bout)


@jax.jit
def _rnn_call(x, h0, slab, bout):
    B, T, _ = x.shape
    H = HIDDEN
    vmem = pl.BlockSpec(memory_space=pltpu.MemorySpace.VMEM)
    smem = pl.BlockSpec(memory_space=pltpu.MemorySpace.SMEM)
    outs2d, hT = pl.pallas_call(
        rnn_kernel,
        out_shape=(
            jax.ShapeDtypeStruct((B, T), jnp.float32),       # lane-dense outputs
            jax.ShapeDtypeStruct((1, B, H), jnp.float32),    # final hidden state
        ),
        in_specs=[vmem, vmem, vmem, smem],
        out_specs=(vmem, vmem),
        input_output_aliases={1: 1},                         # h0 -> hT
    )(x, h0, slab, bout)
    return outs2d.reshape(B, T, 1), hT


def rnn_forward(x, h_state, prepared):
    """x: (B, T, 1); h_state: (1, B, H) or None.
    Returns (outs (B, T, 1), h_state (1, B, H)) -- same semantics as the torch module."""
    B, T, _ = x.shape
    x = x.astype(jnp.float32)
    if h_state is None:
        h0 = jnp.zeros((1, B, HIDDEN), jnp.float32)
    else:
        h0 = h_state.astype(jnp.float32)
    slab, bout = prepared
    return _rnn_call(x, h0, slab, bout)


def init_params(key):
    """Deterministic init matching nn.RNN / nn.Linear shapes
    (uniform in +/- 1/sqrt(hidden_size), like PyTorch's default)."""
    H = HIDDEN
    k = 1.0 / jnp.sqrt(jnp.float32(H))
    keys = jax.random.split(key, 6)
    w_ih = jax.random.uniform(keys[0], (H, INPUT_SIZE), jnp.float32, -k, k)
    w_hh = jax.random.uniform(keys[1], (H, H), jnp.float32, -k, k)
    b_ih = jax.random.uniform(keys[2], (H,), jnp.float32, -k, k)
    b_hh = jax.random.uniform(keys[3], (H,), jnp.float32, -k, k)
    w_out = jax.random.uniform(keys[4], (1, H), jnp.float32, -k, k)
    b_out = jax.random.uniform(keys[5], (1,), jnp.float32, -k, k)
    return (w_ih, w_hh, b_ih, b_hh, w_out, b_out)


def _ref_forward(x, h_state, params):
    """Pure-JAX reference for correctness check (torch-layout params)."""
    w_ih, w_hh, b_ih, b_hh, w_out, b_out = params
    B, T, _ = x.shape
    h = jnp.zeros((B, HIDDEN), jnp.float32) if h_state is None else h_state[0]
    outs = []
    for t in range(T):
        h = jnp.tanh(x[:, t, :] @ w_ih.T + b_ih + h @ w_hh.T + b_hh)
        outs.append(h @ w_out.T + b_out)
    return jnp.stack(outs, axis=1), h[None]


if __name__ == "__main__":
    key = jax.random.PRNGKey(0)
    kx, kp = jax.random.split(key)
    B = 2
    x = jax.random.normal(kx, (B, TIME_STEP, INPUT_SIZE), jnp.float32)
    params = init_params(kp)
    prepared = prepare_params(params)   # one-time layout prep, not per call

    # first call: h_state = None (matches the module-level `h_state = None`)
    h_state = None
    outs, h_state = rnn_forward(x, h_state, prepared)
    outs = jax.block_until_ready(outs)
    h_state = jax.block_until_ready(h_state)

    outs_ref, h_ref = _ref_forward(x, None, params)
    assert outs.shape == (B, TIME_STEP, 1)
    assert h_state.shape == (1, B, HIDDEN)
    assert jnp.allclose(outs, outs_ref, atol=1e-5)
    assert jnp.allclose(h_state, h_ref, atol=1e-5)

    # second call: feed the returned hidden state back in (stateful usage)
    outs2, h_state2 = rnn_forward(x, h_state, prepared)
    outs2 = jax.block_until_ready(outs2)
    h_state2 = jax.block_until_ready(h_state2)
    outs2_ref, h2_ref = _ref_forward(x, h_ref, params)
    assert jnp.allclose(outs2, outs2_ref, atol=1e-5)
    assert jnp.allclose(h_state2, h2_ref, atol=1e-5)

    print("KERNEL_OK")
</pallas_src>

<mosaic_0001>
module attributes {stable_mosaic.version = 11 : i64} {
  func.func @rnn_kernel(%arg0: memref<2x10x1xf32, #tpu.memory_space<vmem>>, %arg1: memref<1x2x32xf32, #tpu.memory_space<vmem>>, %arg2: memref<40x128xf32, #tpu.memory_space<vmem>>, %arg3: memref<1xf32, #tpu.memory_space<smem>>, %arg4: memref<2x10xf32, #tpu.memory_space<vmem>>, %arg5: memref<1x2x32xf32, #tpu.memory_space<vmem>>) attributes {dimension_semantics = [], scalar_prefetch = 0 : i64, scratch_operands = 0 : i64, tpu.core_type = #tpu.core_type<tc>} {
    %c0 = arith.constant 0 : index
    %c0_0 = arith.constant 0 : index
    %0 = vector.load %arg2[%c0, %c0_0] : memref<40x128xf32, #tpu.memory_space<vmem>>, vector<40x128xf32>
    %1 = vector.extract_strided_slice %0 {offsets = [0, 0], sizes = [32, 128], strides = [1, 1]} : vector<40x128xf32> to vector<32x128xf32>
    %2 = vector.extract_strided_slice %0 {offsets = [32, 0], sizes = [1, 32], strides = [1, 1]} : vector<40x128xf32> to vector<1x32xf32>
    %3 = vector.shape_cast %2 : vector<1x32xf32> to vector<1x1x32xf32>
    %4 = vector.extract_strided_slice %0 {offsets = [33, 0], sizes = [1, 32], strides = [1, 1]} : vector<40x128xf32> to vector<1x32xf32>
    %5 = vector.shape_cast %4 : vector<1x32xf32> to vector<1x1x32xf32>
    %c0_1 = arith.constant 0 : index
    %c0_2 = arith.constant 0 : index
    %c0_3 = arith.constant 0 : index
    %6 = vector.load %arg0[%c0_1, %c0_2, %c0_3] : memref<2x10x1xf32, #tpu.memory_space<vmem>>, vector<2x10x1xf32>
    %7 = vector.broadcast %6 : vector<2x10x1xf32> to vector<2x10x32xf32>
    %8 = vector.broadcast %3 : vector<1x1x32xf32> to vector<2x10x32xf32>
    %9 = arith.mulf %7, %8 : vector<2x10x32xf32>
    %10 = vector.broadcast %5 : vector<1x1x32xf32> to vector<2x10x32xf32>
    %11 = arith.addf %9, %10 : vector<2x10x32xf32>
    %c0_4 = arith.constant 0 : index
    %c0_5 = arith.constant 0 : index
    %c0_6 = arith.constant 0 : index
    %12 = vector.load %arg1[%c0_4, %c0_5, %c0_6] : memref<1x2x32xf32, #tpu.memory_space<vmem>>, vector<1x2x32xf32>
    %13 = vector.shape_cast %12 : vector<1x2x32xf32> to vector<2x32xf32>
    %cst = arith.constant dense<0.000000e+00> : vector<2x128xf32>
    %14 = tpu.matmul %13, %1, %cst {dimension_numbers = #tpu.dot_dimension_numbers<[1], [0], [0], [1], [0, 0, 1, 1], [], []>} : vector<2x32xf32>, vector<32x128xf32>, vector<2x128xf32> -> vector<2x128xf32>
    %15 = vector.extract_strided_slice %11 {offsets = [0, 0, 0], sizes = [2, 1, 32], strides = [1, 1, 1]} : vector<2x10x32xf32> to vector<2x1x32xf32>
    %16 = vector.shape_cast %15 : vector<2x1x32xf32> to vector<2x32xf32>
    %17 = vector.extract_strided_slice %14 {offsets = [0, 0], sizes = [2, 32], strides = [1, 1]} : vector<2x128xf32> to vector<2x32xf32>
    %18 = arith.addf %16, %17 : vector<2x32xf32>
    %19 = math.tanh %18 : vector<2x32xf32>
    %cst_7 = arith.constant dense<0.000000e+00> : vector<2x128xf32>
    %20 = tpu.matmul %19, %1, %cst_7 {dimension_numbers = #tpu.dot_dimension_numbers<[1], [0], [0], [1], [0, 0, 1, 1], [], []>} : vector<2x32xf32>, vector<32x128xf32>, vector<2x128xf32> -> vector<2x128xf32>
    %21 = vector.extract_strided_slice %20 {offsets = [0, 32], sizes = [2, 1], strides = [1, 1]} : vector<2x128xf32> to vector<2x1xf32>
    %22 = vector.extract_strided_slice %11 {offsets = [0, 1, 0], sizes = [2, 1, 32], strides = [1, 1, 1]} : vector<2x10x32xf32> to vector<2x1x32xf32>
    %23 = vector.shape_cast %22 : vector<2x1x32xf32> to vector<2x32xf32>
    %24 = vector.extract_strided_slice %20 {offsets = [0, 0], sizes = [2, 32], strides = [1, 1]} : vector<2x128xf32> to vector<2x32xf32>
    %25 = arith.addf %23, %24 : vector<2x32xf32>
    %26 = math.tanh %25 : vector<2x32xf32>
    %cst_8 = arith.constant dense<0.000000e+00> : vector<2x128xf32>
    %27 = tpu.matmul %26, %1, %cst_8 {dimension_numbers = #tpu.dot_dimension_numbers<[1], [0], [0], [1], [0, 0, 1, 1], [], []>} : vector<2x32xf32>, vector<32x128xf32>, vector<2x128xf32> -> vector<2x128xf32>
    %28 = vector.extract_strided_slice %27 {offsets = [0, 32], sizes = [2, 1], strides = [1, 1]} : vector<2x128xf32> to vector<2x1xf32>
    %29 = vector.extract_strided_slice %11 {offsets = [0, 2, 0], sizes = [2, 1, 32], strides = [1, 1, 1]} : vector<2x10x32xf32> to vector<2x1x32xf32>
    %30 = vector.shape_cast %29 : vector<2x1x32xf32> to vector<2x32xf32>
    %31 = vector.extract_strided_slice %27 {offsets = [0, 0], sizes = [2, 32], strides = [1, 1]} : vector<2x128xf32> to vector<2x32xf32>
    %32 = arith.addf %30, %31 : vector<2x32xf32>
    %33 = math.tanh %32 : vector<2x32xf32>
    %cst_9 = arith.constant dense<0.000000e+00> : vector<2x128xf32>
    %34 = tpu.matmul %33, %1, %cst_9 {dimension_numbers = #tpu.dot_dimension_numbers<[1], [0], [0], [1], [0, 0, 1, 1], [], []>} : vector<2x32xf32>, vector<32x128xf32>, vector<2x128xf32> -> vector<2x128xf32>
    %35 = vector.extract_strided_slice %34 {offsets = [0, 32], sizes = [2, 1], strides = [1, 1]} : vector<2x128xf32> to vector<2x1xf32>
    %36 = vector.extract_strided_slice %11 {offsets = [0, 3, 0], sizes = [2, 1, 32], strides = [1, 1, 1]} : vector<2x10x32xf32> to vector<2x1x32xf32>
    %37 = vector.shape_cast %36 : vector<2x1x32xf32> to vector<2x32xf32>
    %38 = vector.extract_strided_slice %34 {offsets = [0, 0], sizes = [2, 32], strides = [1, 1]} : vector<2x128xf32> to vector<2x32xf32>
    %39 = arith.addf %37, %38 : vector<2x32xf32>
    %40 = math.tanh %39 : vector<2x32xf32>
    %cst_10 = arith.constant dense<0.000000e+00> : vector<2x128xf32>
    %41 = tpu.matmul %40, %1, %cst_10 {dimension_numbers = #tpu.dot_dimension_numbers<[1], [0], [0], [1], [0, 0, 1, 1], [], []>} : vector<2x32xf32>, vector<32x128xf32>, vector<2x128xf32> -> vector<2x128xf32>
    %42 = vector.extract_strided_slice %41 {offsets = [0, 32], sizes = [2, 1], strides = [1, 1]} : vector<2x128xf32> to vector<2x1xf32>
    %43 = vector.extract_strided_slice %11 {offsets = [0, 4, 0], sizes = [2, 1, 32], strides = [1, 1, 1]} : vector<2x10x32xf32> to vector<2x1x32xf32>
    %44 = vector.shape_cast %43 : vector<2x1x32xf32> to vector<2x32xf32>
    %45 = vector.extract_strided_slice %41 {offsets = [0, 0], sizes = [2, 32], strides = [1, 1]} : vector<2x128xf32> to vector<2x32xf32>
    %46 = arith.addf %44, %45 : vector<2x32xf32>
    %47 = math.tanh %46 : vector<2x32xf32>
    %cst_11 = arith.constant dense<0.000000e+00> : vector<2x128xf32>
    %48 = tpu.matmul %47, %1, %cst_11 {dimension_numbers = #tpu.dot_dimension_numbers<[1], [0], [0], [1], [0, 0, 1, 1], [], []>} : vector<2x32xf32>, vector<32x128xf32>, vector<2x128xf32> -> vector<2x128xf32>
    %49 = vector.extract_strided_slice %48 {offsets = [0, 32], sizes = [2, 1], strides = [1, 1]} : vector<2x128xf32> to vector<2x1xf32>
    %50 = vector.extract_strided_slice %11 {offsets = [0, 5, 0], sizes = [2, 1, 32], strides = [1, 1, 1]} : vector<2x10x32xf32> to vector<2x1x32xf32>
    %51 = vector.shape_cast %50 : vector<2x1x32xf32> to vector<2x32xf32>
    %52 = vector.extract_strided_slice %48 {offsets = [0, 0], sizes = [2, 32], strides = [1, 1]} : vector<2x128xf32> to vector<2x32xf32>
    %53 = arith.addf %51, %52 : vector<2x32xf32>
    %54 = math.tanh %53 : vector<2x32xf32>
    %cst_12 = arith.constant dense<0.000000e+00> : vector<2x128xf32>
    %55 = tpu.matmul %54, %1, %cst_12 {dimension_numbers = #tpu.dot_dimension_numbers<[1], [0], [0], [1], [0, 0, 1, 1], [], []>} : vector<2x32xf32>, vector<32x128xf32>, vector<2x128xf32> -> vector<2x128xf32>
    %56 = vector.extract_strided_slice %55 {offsets = [0, 32], sizes = [2, 1], strides = [1, 1]} : vector<2x128xf32> to vector<2x1xf32>
    %57 = vector.extract_strided_slice %11 {offsets = [0, 6, 0], sizes = [2, 1, 32], strides = [1, 1, 1]} : vector<2x10x32xf32> to vector<2x1x32xf32>
    %58 = vector.shape_cast %57 : vector<2x1x32xf32> to vector<2x32xf32>
    %59 = vector.extract_strided_slice %55 {offsets = [0, 0], sizes = [2, 32], strides = [1, 1]} : vector<2x128xf32> to vector<2x32xf32>
    %60 = arith.addf %58, %59 : vector<2x32xf32>
    %61 = math.tanh %60 : vector<2x32xf32>
    %cst_13 = arith.constant dense<0.000000e+00> : vector<2x128xf32>
    %62 = tpu.matmul %61, %1, %cst_13 {dimension_numbers = #tpu.dot_dimension_numbers<[1], [0], [0], [1], [0, 0, 1, 1], [], []>} : vector<2x32xf32>, vector<32x128xf32>, vector<2x128xf32> -> vector<2x128xf32>
    %63 = vector.extract_strided_slice %62 {offsets = [0, 32], sizes = [2, 1], strides = [1, 1]} : vector<2x128xf32> to vector<2x1xf32>
    %64 = vector.extract_strided_slice %11 {offsets = [0, 7, 0], sizes = [2, 1, 32], strides = [1, 1, 1]} : vector<2x10x32xf32> to vector<2x1x32xf32>
    %65 = vector.shape_cast %64 : vector<2x1x32xf32> to vector<2x32xf32>
    %66 = vector.extract_strided_slice %62 {offsets = [0, 0], sizes = [2, 32], strides = [1, 1]} : vector<2x128xf32> to vector<2x32xf32>
    %67 = arith.addf %65, %66 : vector<2x32xf32>
    %68 = math.tanh %67 : vector<2x32xf32>
    %cst_14 = arith.constant dense<0.000000e+00> : vector<2x128xf32>
    %69 = tpu.matmul %68, %1, %cst_14 {dimension_numbers = #tpu.dot_dimension_numbers<[1], [0], [0], [1], [0, 0, 1, 1], [], []>} : vector<2x32xf32>, vector<32x128xf32>, vector<2x128xf32> -> vector<2x128xf32>
    %70 = vector.extract_strided_slice %69 {offsets = [0, 32], sizes = [2, 1], strides = [1, 1]} : vector<2x128xf32> to vector<2x1xf32>
    %71 = vector.extract_strided_slice %11 {offsets = [0, 8, 0], sizes = [2, 1, 32], strides = [1, 1, 1]} : vector<2x10x32xf32> to vector<2x1x32xf32>
    %72 = vector.shape_cast %71 : vector<2x1x32xf32> to vector<2x32xf32>
    %73 = vector.extract_strided_slice %69 {offsets = [0, 0], sizes = [2, 32], strides = [1, 1]} : vector<2x128xf32> to vector<2x32xf32>
    %74 = arith.addf %72, %73 : vector<2x32xf32>
    %75 = math.tanh %74 : vector<2x32xf32>
    %cst_15 = arith.constant dense<0.000000e+00> : vector<2x128xf32>
    %76 = tpu.matmul %75, %1, %cst_15 {dimension_numbers = #tpu.dot_dimension_numbers<[1], [0], [0], [1], [0, 0, 1, 1], [], []>} : vector<2x32xf32>, vector<32x128xf32>, vector<2x128xf32> -> vector<2x128xf32>
    %77 = vector.extract_strided_slice %76 {offsets = [0, 32], sizes = [2, 1], strides = [1, 1]} : vector<2x128xf32> to vector<2x1xf32>
    %78 = vector.extract_strided_slice %11 {offsets = [0, 9, 0], sizes = [2, 1, 32], strides = [1, 1, 1]} : vector<2x10x32xf32> to vector<2x1x32xf32>
    %79 = vector.shape_cast %78 : vector<2x1x32xf32> to vector<2x32xf32>
    %80 = vector.extract_strided_slice %76 {offsets = [0, 0], sizes = [2, 32], strides = [1, 1]} : vector<2x128xf32> to vector<2x32xf32>
    %81 = arith.addf %79, %80 : vector<2x32xf32>
    %82 = math.tanh %81 : vector<2x32xf32>
    %cst_16 = arith.constant dense<0.000000e+00> : vector<2x128xf32>
    %83 = tpu.matmul %82, %1, %cst_16 {dimension_numbers = #tpu.dot_dimension_numbers<[1], [0], [0], [1], [0, 0, 1, 1], [], []>} : vector<2x32xf32>, vector<32x128xf32>, vector<2x128xf32> -> vector<2x128xf32>
    %84 = vector.extract_strided_slice %83 {offsets = [0, 32], sizes = [2, 1], strides = [1, 1]} : vector<2x128xf32> to vector<2x1xf32>
    %c0_17 = arith.constant 0 : index
    %c0_18 = arith.constant 0 : index
    %c0_19 = arith.constant 0 : index
    %85 = vector.load %arg5[%c0_17, %c0_18, %c0_19] : memref<1x2x32xf32, #tpu.memory_space<vmem>>, vector<1x2x32xf32>
    %86 = vector.shape_cast %85 : vector<1x2x32xf32> to vector<2x32xf32>
    %87 = vector.shape_cast %82 : vector<2x32xf32> to vector<1x2x32xf32>
    tpu.vector_store %arg5[%c0_17, %c0_18, %c0_19], %87 {strides = array<i32>} : memref<1x2x32xf32, #tpu.memory_space<vmem>>, vector<1x2x32xf32>,
    %88 = tpu.concatenate %21, %28, %35, %42, %49, %56, %63, %70, %77, %84 in 1 : vector<2x1xf32>, vector<2x1xf32>, vector<2x1xf32>, vector<2x1xf32>, vector<2x1xf32>, vector<2x1xf32>, vector<2x1xf32>, vector<2x1xf32>, vector<2x1xf32>, vector<2x1xf32> -> vector<2x10xf32>
    %c0_20 = arith.constant 0 : index
    %89 = memref.load %arg3[%c0_20] : memref<1xf32, #tpu.memory_space<smem>>
    %90 = vector.broadcast %89 : f32 to vector<2x10xf32>
    %91 = arith.addf %88, %90 : vector<2x10xf32>
    %c0_21 = arith.constant 0 : index
    %c0_22 = arith.constant 0 : index
    %92 = vector.load %arg4[%c0_21, %c0_22] : memref<2x10xf32, #tpu.memory_space<vmem>>, vector<2x10xf32>
    tpu.vector_store %arg4[%c0_21, %c0_22], %91 {strides = array<i32>} : memref<2x10xf32, #tpu.memory_space<vmem>>, vector<2x10xf32>,
    return
  }
}

</mosaic_0001>

<bundles_post_ra>
// kernel: _rnn_call.1
= control target key start
LH: loop header
LB: loop body
LE: loop exit
PB: predicated region body
PF: predicated region fallthrough
CT: control target
= control target key end

     0   :  { %v1406_v3 = vmov 0.0|0.0   ;;  %vm1407_vm0 = vmmov 0   ;;  %v1408_v6 = vmov 0.0   ;;  %v1409_v8 = vmov 0   ;;  %s1622_s0 = inlined_call_operand.vmem [shape: f32[2,10,1], index: 0, kind: input, shape index: {}]   ;;  %s1623_s1 = inlined_call_operand.vmem [shape: f32[1,2,32], index: 1, kind: input, shape index: {}, may-alias: {1,5}]   ;;  %s1624_s2 = inlined_call_operand.vmem [shape: f32[40,128], index: 2, kind: input, shape index: {}]   ;;  %s1625_s3 = inlined_call_operand.<no memory space> [shape: f32[1], index: 3, kind: input, shape index: {}]   ;;  %s1626_s4 = inlined_call_operand.hbm [shape: f32[2,10], index: 4, kind: output, shape index: {0}]   ;;  %s1627_s5 = inlined_call_operand.vmem [shape: f32[1,2,32], index: 5, kind: output, shape index: {1}, may-alias: {1,5}]  }
   0x1   :  { %v21_v0 = vld [vmem:[%s1624_s2] sm:$0xff]  ;;  %v22_v1 = vld [vmem:[%s1624_s2 + $0x8] sm:$0xff]  ;;  %v23_v2 = vld [vmem:[%s1624_s2 + $0x10] sm:$0xff]  ;;  %1259 = vmatprep.subr.bf16.mxu0 %v1406_v3  ;;  %1146 = vmatprep.mubr.msk.f32.mxu0 %vm1407_vm0, %v1408_v6 }
   0x2   :  { %v1461_v4 = vpack.c.bf16 %v22_v1, %v21_v0  ;;  %v24_v5 = vld [vmem:[%s1624_s2 + $0x18] sm:$0xff]  ;;  %v28_v7 = vld [vmem:[%s1622_s0 + $0x10] sm:$0xff]  ;;  %1340 = vset.pattern.permute.xlu0 %v1409_v8  ;;  %1265 = vmatprep.subr.bf16.mxu1 %v1406_v3 }
   0x3   :  { %12 = vsyncpa [#allocation4], 0  ;;  %v1473_v9 = vpack.c.bf16 %v24_v5, %v23_v2  ;;  %42 = vperm.xlu0 %1340, %v28_v7   ;;  %v26_v10 = vld [vmem:[%s1622_s0] sm:$0xff]  ;;  %1157 = vmatprep.mubr.msk.f32.mxu1 %vm1407_vm0, %v1408_v6  ;;  %vm67_vm1 = vcmask 261120   ;;  %v50_v12 = vlaneseq  ;;  %vm152_vm2 = vcmask 1041409   ;;  %s1410_s11 = smov 96  }
   0x4   :  { %1261 = vmatpush3.bf16.msra.mxu0 %v1461_v4  ;;  %1267 = vmatpush3.bf16.msra.mxu1 %v1461_v4  ;;  %v66_v11 = vld [vmem:[%s1623_s1] sm:$0x3]  ;;  %v29_v34 = vld [vmem:[%s1622_s0 + $0x18] sm:$0x3]  ;;  %v27_v35 = vld [vmem:[%s1622_s0 + $0x8] sm:$0x3] }
   0x5   :  { %1262 = vmatprep.subr.bf16.mxu0 %v1406_v3  ;;  %1268 = vmatprep.subr.bf16.mxu1 %v1406_v3  ;;  %v51_v13 = vshrl.u32 %v50_v12, 7  ;;  %v25_v16 = vld [vmem:[%s1624_s2 + $0x20] sm:$0xff]  ;;  %s1411_s0 = smov 97   ;;  %s1412_s12 = smov 98   ;;  %vm995_vm3 = vcmask 1042434   ;;  %vm998_vm4 = vcmask 256001  }
   0x6   :  { %1341 = vset.pattern.permute.xlu1 %v1409_v8  ;;  %s1413_s13 = smov 99   ;;  %s1414_s14 = smov 100   ;;  %vm1031_vm5 = vcmask 7168   ;;  %vm1033_vm6 = vcmask 15360   ;;  %vm1035_vm7 = vcmask 23552   ;;  %vm1037_vm8 = vcmask 31744  }
   0x7   :  { %32 = vperm.xlu0 %1340, %v26_v10   ;;  %v52_v15 = vsub.s32 0, %v51_v13  ;;  %v60_v17 = vsub.s32 1, %v51_v13  ;;  %47 = vperm.xlu1 %1341, %v29_v34   ;;  %s1415_s15 = smov 101   ;;  %s1416_s16 = smov 102   ;;  %vm1039_vm9 = vcmask 39936   ;;  %vm1041_vm10 = vcmask 48128  }
   0x8   :  { %1264 = vmatpush3.bf16.msra.mxu0 %v1473_v9  ;;  %1270 = vmatpush3.bf16.msra.mxu1 %v1473_v9  ;;  %s1417_s17 = smov 103   ;;  %s1418_s18 = smov 104   ;;  %vm1043_vm11 = vcmask 56320   ;;  %vm1045_vm12 = vcmask 64512   ;;  %vm1047_vm13 = vcmask 72704   ;;  %vm1052_vm14 = vcmask 74752  }
   0x9   :  { %1271 = vmatprep.subr.bf16.mxu0 %v1406_v3  ;;  %1277 = vmatprep.subr.bf16.mxu1 %v1406_v3  ;;  %v1500_v18 = vrot.slane %v25_v16, %v52_v15  ;;  %v1502_v20 = vrot.slane %v25_v16, %v60_v17  ;;  %s1419_s21 = smov 105   ;;  %s1420_s23 = smov [#allocation3]  }
   0xa   :  { %s1060_s24 = sshll.u32 %s1420_s23, 4  ;;  %s1061_s24 = int_to_ptr.vmem [resolvable:$true] %s1060_s24 }
   0xb   :  { %1147 = vmatmul.mubr.msk.f32.vlgmr.msra.gmra.mrb[0].mxu0 %vm67_vm1, %v66_v11  ;;  %37 = vperm.xlu1 %1341, %v27_v35   ;;  %s1382_s25 = scalar_lea.vmem %s1061_s24, 32  ;;  %p1387_p1 = scmp.lt.s32.totalorder %s1061_s24, %s1061_s24 }
   0xc   :  { %1273 = vmatpush3.bf16.msra.mxu0 %v1461_v4  ;;  %1168 = vmatprep.mubr.msk.f32.mxu0 %vm1407_vm0, %v1408_v6  ;;  %p1383_p0 = scmp.ne.s32.totalorder %s1061_s24, %s1382_s25  ;;  %p1388_p2 = scmp.lt.s32.totalorder %s1382_s25, %s1382_s25 }
   0xd   :  { %1274 = vmatprep.subr.bf16.mxu0 %v1406_v3 }
   0xe   :  { %p1389_p3 = por %p1388_p2, %p1387_p1 }
  0x10   :  { %1276 = vmatpush3.bf16.msra.mxu0 %v1473_v9  ;;  %p1390_p4 = pnand %p1389_p3, %p1383_p0 }
  0x11   :  { %1283 = vmatprep.subr.bf16.mxu0 %v1406_v3 }
  0x82   :  { %v43_v14 = vpop.permute.xlu0 %42 }
  0x83   :  { %v56_v22 = vmul.f32 %v1500_v18, %v43_v14 }
  0x85   :  { %v1510_v25 = vadd.f32 %v1502_v20, %v56_v22 }
  0x86   :  { %v33_v19 = vpop.permute.xlu0 %32 }
  0x87   :  { %v54_v21 = vmul.f32 %v1500_v18, %v33_v19 }
  0x89   :  { %v1507_v23 = vadd.f32 %v1502_v20, %v54_v21 }
  0xde   :  { %v137_v24 = vpop.f32.mrb[0].mxu0 }
  0xdf   :  { %v142_v26 = vrot.slane %v137_v24, 1  ;;  %v1148_v27 = vpop.f32.mrb[1].mxu0  ;;  %v145_v28 = vadd.f32 %v137_v24, %v1507_v23 }
  0xe1   :  { %v146_v29 = vadd.f32 %v142_v26, %v1510_v25 }
  0xe3   :  { %1342 = vtanh.f32 %v146_v29 }
  0xe4   :  { %1344 = vtanh.f32 %v145_v28 }
  0xed   :  { %v1343_v30 = vpop.eup %1342 }
  0xee   :  { %v151_v31 = vrot.slane %v1343_v30, 7  ;;  %v1345_v32 = vpop.eup %1344 }
  0xf0   :  { %v153_v33 = vsel %vm152_vm2, %v151_v31, %v1345_v32 }
  0xf1   :  { %1158 = vmatmul.mubr.msk.f32.vlgmr.msra.gmra.mrb[0].mxu1 %vm67_vm1, %v153_v33 }
  0xf2   :  { %1279 = vmatpush3.bf16.msra.mxu1 %v1461_v4  ;;  %1179 = vmatprep.mubr.msk.f32.mxu1 %vm1407_vm0, %v1408_v6 }
  0xf3   :  { %1280 = vmatprep.subr.bf16.mxu1 %v1406_v3 }
  0xf6   :  { %1282 = vmatpush3.bf16.msra.mxu1 %v1473_v9 }
  0xf7   :  { %1289 = vmatprep.subr.bf16.mxu1 %v1406_v3 }
 0x1c4   :  { %v222_v36 = vpop.f32.mrb[0].mxu1 }
 0x1c5   :  { %v227_v37 = vrot.slane %v222_v36, 7  ;;  %1000 = vrot.lane.b32.xlu0 %v222_v36, %s1410_s11  ;;  %v1159_v38 = vpop.f32.mrb[1].mxu1  ;;  %v231_v40 = vadd.f32 %v222_v36, %v1510_v25 }
 0x1c7   :  { %v230_v39 = vadd.f32 %v227_v37, %v1507_v23 }
 0x1c9   :  { %1346 = vtanh.f32 %v230_v39 }
 0x1ca   :  { %1348 = vtanh.f32 %v231_v40 }
 0x1d3   :  { %v1347_v41 = vpop.eup %1346 }
 0x1d4   :  { %v236_v42 = vrot.slane %v1347_v41, 1  ;;  %v1349_v43 = vpop.eup %1348 }
 0x1d6   :  { %v237_v44 = vsel %vm152_vm2, %v1349_v43, %v236_v42 }
 0x1d7   :  { %1169 = vmatmul.mubr.msk.f32.vlgmr.msra.gmra.mrb[2].mxu0 %vm67_vm1, %v237_v44 }
 0x1d8   :  { %1285 = vmatpush3.bf16.msra.mxu0 %v1461_v4  ;;  %1190 = vmatprep.mubr.msk.f32.mxu0 %vm1407_vm0, %v1408_v6 }
 0x1d9   :  { %1286 = vmatprep.subr.bf16.mxu0 %v1406_v3 }
 0x1dc   :  { %1288 = vmatpush3.bf16.msra.mxu0 %v1473_v9 }
 0x1dd   :  { %1295 = vmatprep.subr.bf16.mxu0 %v1406_v3 }
 0x2aa   :  { %v306_v45 = vpop.f32.mrb[2].mxu0 }
 0x2ab   :  { %v311_v46 = vrot.slane %v306_v45, 6  ;;  %v312_v47 = vrot.slane %v306_v45, 7  ;;  %1003 = vrot.lane.b32.xlu1 %v306_v45, %s1411_s0  ;;  %v1170_v48 = vpop.f32.mrb[3].mxu0 }
 0x2ad   :  { %v315_v49 = vadd.f32 %v311_v46, %v1507_v23  ;;  %v316_v50 = vadd.f32 %v312_v47, %v1510_v25 }
 0x2af   :  { %1350 = vtanh.f32 %v315_v49 }
 0x2b0   :  { %1352 = vtanh.f32 %v316_v50 }
 0x2b9   :  { %v1351_v51 = vpop.eup %1350 }
 0x2ba   :  { %v1353_v52 = vpop.eup %1352  ;;  %v321_v53 = vrot.slane %v1351_v51, 2 }
 0x2bb   :  { %v322_v54 = vrot.slane %v1353_v52, 1 }
 0x2bd   :  { %v323_v55 = vsel %vm152_vm2, %v322_v54, %v321_v53 }
 0x2be   :  { %1180 = vmatmul.mubr.msk.f32.vlgmr.msra.gmra.mrb[2].mxu1 %vm67_vm1, %v323_v55 }
 0x2bf   :  { %1291 = vmatpush3.bf16.msra.mxu1 %v1461_v4  ;;  %1201 = vmatprep.mubr.msk.f32.mxu1 %vm1407_vm0, %v1408_v6 }
 0x2c0   :  { %1292 = vmatprep.subr.bf16.mxu1 %v1406_v3 }
 0x2c3   :  { %1294 = vmatpush3.bf16.msra.mxu1 %v1473_v9 }
 0x2c4   :  { %1301 = vmatprep.subr.bf16.mxu1 %v1406_v3 }
 0x391   :  { %v392_v56 = vpop.f32.mrb[2].mxu1 }
 0x392   :  { %v397_v57 = vrot.slane %v392_v56, 5  ;;  %v398_v58 = vrot.slane %v392_v56, 6  ;;  %1006 = vrot.lane.b32.xlu0 %v392_v56, %s1412_s12  ;;  %v1181_v59 = vpop.f32.mrb[3].mxu1 }
 0x394   :  { %v401_v60 = vadd.f32 %v397_v57, %v1507_v23  ;;  %v402_v61 = vadd.f32 %v398_v58, %v1510_v25 }
 0x396   :  { %1354 = vtanh.f32 %v401_v60 }
 0x397   :  { %1356 = vtanh.f32 %v402_v61 }
 0x3a0   :  { %v1355_v62 = vpop.eup %1354 }
 0x3a1   :  { %v1357_v63 = vpop.eup %1356  ;;  %v407_v0 = vrot.slane %v1355_v62, 3 }
 0x3a2   :  { %v408_v1 = vrot.slane %v1357_v63, 2 }
 0x3a4   :  { %v409_v2 = vsel %vm152_vm2, %v408_v1, %v407_v0 }
 0x3a5   :  { %1191 = vmatmul.mubr.msk.f32.vlgmr.msra.gmra.mrb[4].mxu0 %vm67_vm1, %v409_v2 }
 0x3a6   :  { %1297 = vmatpush3.bf16.msra.mxu0 %v1461_v4  ;;  %1212 = vmatprep.mubr.msk.f32.mxu0 %vm1407_vm0, %v1408_v6 }
 0x3a7   :  { %1298 = vmatprep.subr.bf16.mxu0 %v1406_v3 }
 0x3aa   :  { %1300 = vmatpush3.bf16.msra.mxu0 %v1473_v9 }
 0x3ab   :  { %1307 = vmatprep.subr.bf16.mxu0 %v1406_v3 }
 0x478   :  { %v478_v5 = vpop.f32.mrb[4].mxu0 }
 0x479   :  { %v483_v7 = vrot.slane %v478_v5, 4  ;;  %v484_v8 = vrot.slane %v478_v5, 5  ;;  %1009 = vrot.lane.b32.xlu1 %v478_v5, %s1413_s13  ;;  %v1192_v10 = vpop.f32.mrb[5].mxu0 }
 0x47b   :  { %v487_v11 = vadd.f32 %v483_v7, %v1507_v23  ;;  %v488_v12 = vadd.f32 %v484_v8, %v1510_v25 }
 0x47d   :  { %1358 = vtanh.f32 %v487_v11 }
 0x47e   :  { %1360 = vtanh.f32 %v488_v12 }
 0x487   :  { %v1359_v13 = vpop.eup %1358 }
 0x488   :  { %v1361_v14 = vpop.eup %1360  ;;  %v493_v15 = vrot.slane %v1359_v13, 4 }
 0x489   :  { %v494_v16 = vrot.slane %v1361_v14, 3 }
 0x48b   :  { %v495_v17 = vsel %vm152_vm2, %v494_v16, %v493_v15  ;;  %v1001_v15 = vpop.permute.xlu0 %1000 }
 0x48c   :  { %1202 = vmatmul.mubr.msk.f32.vlgmr.msra.gmra.mrb[4].mxu1 %vm67_vm1, %v495_v17 }
 0x48d   :  { %1303 = vmatpush3.bf16.msra.mxu1 %v1461_v4  ;;  %1223 = vmatprep.mubr.msk.f32.mxu1 %vm1407_vm0, %v1408_v6 }
 0x48e   :  { %1304 = vmatprep.subr.bf16.mxu1 %v1406_v3 }
 0x48f   :  { %v1007_v17 = vpop.permute.xlu0 %1006 }
 0x491   :  { %1306 = vmatpush3.bf16.msra.mxu1 %v1473_v9 }
 0x492   :  { %1313 = vmatprep.subr.bf16.mxu1 %v1406_v3 }
 0x55f   :  { %v564_v19 = vpop.f32.mrb[4].mxu1 }
 0x560   :  { %v569_v21 = vrot.slane %v564_v19, 3  ;;  %v570_v22 = vrot.slane %v564_v19, 4  ;;  %1012 = vrot.lane.b32.xlu0 %v564_v19, %s1414_s14  ;;  %v1203_v24 = vpop.f32.mrb[5].mxu1 }
 0x562   :  { %v573_v26 = vadd.f32 %v569_v21, %v1507_v23  ;;  %v574_v27 = vadd.f32 %v570_v22, %v1510_v25 }
 0x564   :  { %1362 = vtanh.f32 %v573_v26 }
 0x565   :  { %1364 = vtanh.f32 %v574_v27 }
 0x56e   :  { %v1363_v28 = vpop.eup %1362 }
 0x56f   :  { %v1365_v29 = vpop.eup %1364  ;;  %v579_v30 = vrot.slane %v1363_v28, 5 }
 0x570   :  { %v580_v31 = vrot.slane %v1365_v29, 4 }
 0x572   :  { %v581_v32 = vsel %vm152_vm2, %v580_v31, %v579_v30 }
 0x573   :  { %1213 = vmatmul.mubr.msk.f32.vlgmr.msra.gmra.mrb[6].mxu0 %vm67_vm1, %v581_v32 }
 0x574   :  { %1309 = vmatpush3.bf16.msra.mxu0 %v1461_v4  ;;  %1234 = vmatprep.mubr.msk.f32.mxu0 %vm1407_vm0, %v1408_v6 }
 0x575   :  { %1310 = vmatprep.subr.bf16.mxu0 %v1406_v3 }
 0x578   :  { %1312 = vmatpush3.bf16.msra.mxu0 %v1473_v9 }
 0x579   :  { %1319 = vmatprep.subr.bf16.mxu0 %v1406_v3 }
 0x5d2   :  { %v1013_v21 = vpop.permute.xlu0 %1012 }
 0x646   :  { %v650_v33 = vpop.f32.mrb[6].mxu0 }
 0x647   :  { %v655_v34 = vrot.slane %v650_v33, 2  ;;  %v656_v35 = vrot.slane %v650_v33, 3  ;;  %1015 = vrot.lane.b32.xlu1 %v650_v33, %s1415_s15  ;;  %v1214_v36 = vpop.f32.mrb[7].mxu0 }
 0x649   :  { %v659_v37 = vadd.f32 %v655_v34, %v1507_v23  ;;  %v660_v38 = vadd.f32 %v656_v35, %v1510_v25  ;;  %v1050_v35 = vstv %s1625_s3 }
 0x64b   :  { %1366 = vtanh.f32 %v659_v37 }
 0x64c   :  { %1368 = vtanh.f32 %v660_v38 }
 0x655   :  { %v1367_v39 = vpop.eup %1366 }
 0x656   :  { %v1369_v40 = vpop.eup %1368  ;;  %v665_v41 = vrot.slane %v1367_v39, 6 }
 0x657   :  { %v666_v42 = vrot.slane %v1369_v40, 5 }
 0x659   :  { %v667_v43 = vsel %vm152_vm2, %v666_v42, %v665_v41 }
 0x65a   :  { %1224 = vmatmul.mubr.msk.f32.vlgmr.msra.gmra.mrb[6].mxu1 %vm67_vm1, %v667_v43 }
 0x65b   :  { %1315 = vmatpush3.bf16.msra.mxu1 %v1461_v4  ;;  %1245 = vmatprep.mubr.msk.f32.mxu1 %vm1407_vm0, %v1408_v6 }
 0x65c   :  { %1316 = vmatprep.subr.bf16.mxu1 %v1406_v3 }
 0x65f   :  { %1318 = vmatpush3.bf16.msra.mxu1 %v1473_v9 }
 0x72d   :  { %v736_v44 = vpop.f32.mrb[6].mxu1 }
 0x72e   :  { %v741_v45 = vrot.slane %v736_v44, 1  ;;  %v742_v46 = vrot.slane %v736_v44, 2  ;;  %1018 = vrot.lane.b32.xlu0 %v736_v44, %s1416_s16  ;;  %v1225_v47 = vpop.f32.mrb[7].mxu1 }
 0x730   :  { %v745_v48 = vadd.f32 %v741_v45, %v1507_v23  ;;  %v746_v49 = vadd.f32 %v742_v46, %v1510_v25  ;;  %v48_v23 = vpop.permute.xlu1 %47 }
 0x731   :  { %v57_v56 = vmul.f32 %v1500_v18, %v48_v23 }
 0x732   :  { %1370 = vtanh.f32 %v745_v48 }
 0x733   :  { %1372 = vtanh.f32 %v746_v49  ;;  %v65_v59 = vadd.f32 %v1502_v20, %v57_v56 }
 0x734   :  { %v38_v25 = vpop.permute.xlu1 %37 }
 0x735   :  { %v55_v55 = vmul.f32 %v1500_v18, %v38_v25 }
 0x737   :  { %v63_v57 = vadd.f32 %v1502_v20, %v55_v55 }
 0x738   :  { %v1004_v16 = vpop.permute.xlu1 %1003 }
 0x739   :  { %v1032_v24 = vsel %vm1031_vm5, %v1001_v15, %v1004_v16 }
 0x73a   :  { %v1034_v27 = vsel %vm1033_vm6, %v1032_v24, %v1007_v17 }
 0x73c   :  { %v1371_v50 = vpop.eup %1370  ;;  %v1010_v19 = vpop.permute.xlu1 %1009 }
 0x73d   :  { %v1373_v51 = vpop.eup %1372  ;;  %v751_v52 = vrot.slane %v1371_v50, 7  ;;  %v1036_v28 = vsel %vm1035_vm7, %v1034_v27, %v1010_v19 }
 0x73e   :  { %v752_v53 = vrot.slane %v1373_v51, 6  ;;  %v1038_v29 = vsel %vm1037_vm8, %v1036_v28, %v1013_v21 }
 0x740   :  { %v753_v54 = vsel %vm152_vm2, %v752_v53, %v751_v52  ;;  %v1016_v22 = vpop.permute.xlu1 %1015 }
 0x741   :  { %1235 = vmatmul.mubr.msk.f32.vlgmr.msra.gmra.mrb[8].mxu0 %vm67_vm1, %v753_v54  ;;  %v1040_v31 = vsel %vm1039_vm9, %v1038_v29, %v1016_v22 }
 0x742   :  { %1321 = vmatpush3.bf16.msra.mxu0 %v1461_v4  ;;  %1256 = vmatprep.mubr.msk.f32.mxu0 %vm1407_vm0, %v1408_v6 }
 0x743   :  { %1322 = vmatprep.subr.bf16.mxu0 %v1406_v3 }
 0x746   :  { %1324 = vmatpush3.bf16.msra.mxu0 %v1473_v9 }
 0x7a0   :  { %v1019_v26 = vpop.permute.xlu0 %1018 }
 0x7a1   :  { %v1042_v33 = vsel %vm1041_vm10, %v1040_v31, %v1019_v26 }
 0x814   :  { %v822_v58 = vpop.f32.mrb[8].mxu0 }
 0x815   :  { %v827_v60 = vrot.slane %v822_v58, 1  ;;  %1021 = vrot.lane.b32.xlu1 %v822_v58, %s1417_s17  ;;  %v1236_v4 = vpop.f32.mrb[9].mxu0  ;;  %v830_v6 = vadd.f32 %v822_v58, %v63_v57 }
 0x817   :  { %v831_v61 = vadd.f32 %v827_v60, %v65_v59 }
 0x819   :  { %1374 = vtanh.f32 %v831_v61 }
 0x81a   :  { %1376 = vtanh.f32 %v830_v6 }
 0x823   :  { %v1375_v3 = vpop.eup %1374 }
 0x824   :  { %v836_v9 = vrot.slane %v1375_v3, 7  ;;  %v1377_v62 = vpop.eup %1376 }
 0x826   :  { %v837_v63 = vsel %vm152_vm2, %v836_v9, %v1377_v62 }
 0x827   :  { %1246 = vmatmul.mubr.msk.f32.vlgmr.msra.gmra.mrb[8].mxu1 %vm67_vm1, %v837_v63 }
 0x887   :  { %v1022_v30 = vpop.permute.xlu1 %1021 }
 0x888   :  { %v1044_v34 = vsel %vm1043_vm11, %v1042_v33, %v1022_v30 }
 0x8fa   :  { %v906_v18 = vpop.f32.mrb[8].mxu1 }
 0x8fb   :  { %v911_v0 = vrot.slane %v906_v18, 7  ;;  %v915_v1 = vadd.f32 %v906_v18, %v65_v59  ;;  %1024 = vrot.lane.b32.xlu0 %v906_v18, %s1418_s18  ;;  %v1247_v20 = vpop.f32.mrb[9].mxu1 }
 0x8fd   :  { %v914_v2 = vadd.f32 %v911_v0, %v63_v57  ;;  %1378 = vtanh.f32 %v915_v1 }
 0x8ff   :  { %1380 = vtanh.f32 %v914_v2 }
 0x907   :  { %v1379_v5 = vpop.eup %1378 }
 0x908   :  { %v994_v7 = vrot.slane %v1379_v5, 7 }
 0x909   :  { %v1381_v8 = vpop.eup %1380 }
 0x90a   :  { %v996_v10 = vsel %vm995_vm3, %v994_v7, %v1381_v8  ;;  %v920_v11 = vrot.slane %v1381_v8, 1 }
 0x90b   :  { %999 = vst.msk [vmem:[%s1627_s5 - $0x1] sm:$0x6] %vm998_vm4, %v996_v10 }
 0x90c   :  { %v921_v12 = vsel %vm152_vm2, %v1379_v5, %v920_v11 }
 0x90d   :  { %1257 = vmatmul.mubr.msk.f32.vlgmr.msra.gmra.mrb[10].mxu0 %vm67_vm1, %v921_v12 }
 0x96d   :  { %v1025_v32 = vpop.permute.xlu0 %1024 }
 0x96e   :  { %v1046_v36 = vsel %vm1045_vm12, %v1044_v34, %v1025_v32 }
 0x9e0   :  { %v990_v13 = vpop.f32.mrb[10].mxu0 }
 0x9e1   :  { %1028 = vrot.lane.b32.xlu1 %v990_v13, %s1419_s21  ;;  %v1258_v14 = vpop.f32.mrb[11].mxu0 }
 0xa53   :  { %v1029_v37 = vpop.permute.xlu1 %1028 }
 0xa54   :  { %v1048_v38 = vsel %vm1047_vm13, %v1046_v36, %v1029_v37 }
 0xa55   :  { %v1051_v39 = vadd.f32 %v1050_v35, %v1048_v38 }
 0xa57   :  { %1053 = vst.msk [vmem:[#allocation3] sm:$0x3] %vm1052_vm14, %v1051_v39 }
 0xa58   :  { %1393 = shalt.err (!%p1390_p4)
}
 0xa59   :  { %s1394_s3 = scalar_lea.hbm %s1626_s4, 32 }
 0xa5a   :  { %p1395_p5 = scmp.ne.s32.totalorder %s1626_s4, %s1394_s3  ;;  %p1398_p6 = scmp.lt.u32.totalorder %s1394_s3, %s1626_s4 }
 0xa5c   :  { %p1400_p7 = pnand %p1398_p6, %p1395_p5 }
 0xa5e   :  { %1403 = shalt.err (!%p1400_p7)
}
 0xa5f   :  { %1063 = dma.vmem_to_hbm [thread:$0]  %s1061_s24, 32, %s1626_s4, [#allocation4]  }
 0xa60   :  { %1404 = dma.done.wait [#allocation4], 32  }
 0xa61   :  { %1405 = vsyncadd [#allocation4], 4294967264 }
 0xa62   :  { %1071 = vsyncpa [#allocation4], 1 }

</bundles_post_ra>
